<compile_context>
chip_gen: v5e
topology: v5e:2x2
jax: 0.10.0
libtpu: 0.0.40
codegen_flags: <defaults>
</compile_context>

<pallas_src>
import jax
import jax.numpy as jnp
from jax import lax
from jax.experimental import pallas as pl
from jax.experimental.pallas import tpu as pltpu

# ---- problem configuration (small shapes consistent with the module) -------
N, CIN, H, W = 2, 4, 16, 16
COUT, KH, KW = 16, 3, 3
GROUPS = 2
STRIDE, PAD, DIL = 2, 2, 2
EPS = 1e-5

CIN_G = CIN // GROUPS          # 2
COUT_G = COUT // GROUPS        # 8
OH = (H + 2 * PAD - (DIL * (KH - 1) + 1)) // STRIDE + 1   # 8
OW = (W + 2 * PAD - (DIL * (KW - 1) + 1)) // STRIDE + 1   # 8
M = N * OH * OW                # 128  (lane-dense)
K = CIN_G * KH * KW            # 18   (per-group contraction)
KTOT = GROUPS * K              # 36   (block-diagonal contraction)
KTOT_PAD = ((KTOT + 7) // 8) * 8   # 40 (pad to multiple of 8 sublanes)


# ----------------------------- Pallas kernel --------------------------------
def fused_conv_bn_act_kernel(p_ref, w_ref, params_ref, o_ref):
    # p_ref:      (KTOT_PAD, M)   im2col patches, groups stacked block-diagonally
    # w_ref:      (COUT, KTOT_PAD) block-diagonal conv weights
    # params_ref: (COUT, 3)        [conv bias | BN gamma | BN beta]
    # o_ref:      (COUT, M)        channels-major output
    bias = params_ref[:, 0:1]            # (COUT, 1)
    gamma = params_ref[:, 1:2]
    beta = params_ref[:, 2:3]

    # single MXU dot covers both groups (block-diagonal weight)
    v1 = jnp.dot(w_ref[...], p_ref[...],
                 preferred_element_type=jnp.float32) + bias   # (COUT, M)

    # BatchNorm2d (training mode): biased batch statistics over lanes (N*OH*OW),
    # single pass: var = E[x^2] - mean^2, folded into scale/shift.
    inv_m = 1.0 / float(M)
    s1 = jnp.sum(v1, axis=-1, keepdims=True)              # (COUT, 1)
    s2 = jnp.sum(v1 * v1, axis=-1, keepdims=True)         # (COUT, 1)
    mean = s1 * inv_m
    var = jnp.maximum(s2 * inv_m - mean * mean, 0.0)
    scale = gamma * lax.rsqrt(var + EPS)
    shift = beta - mean * scale
    v3 = v1 * scale + shift

    v2 = jnp.maximum(v1, 0.0)                              # relu(v1)
    v4 = jax.nn.sigmoid(v2 + v3)                           # sigmoid(v2 + v3)
    o_ref[...] = v3 * v4                                   # v3 * v4


# ------------------------------ wrapper glue ---------------------------------
def _im2col_grouped_t(x):
    """x: (N, CIN, H, W) -> patches (KTOT_PAD, M), groups stacked along rows."""
    xp = jnp.pad(x, ((0, 0), (0, 0), (PAD, PAD), (PAD, PAD)))
    taps = []
    for kh in range(KH):
        for kw in range(KW):
            h0 = kh * DIL
            w0 = kw * DIL
            sub = xp[:, :,
                     h0:h0 + (OH - 1) * STRIDE + 1:STRIDE,
                     w0:w0 + (OW - 1) * STRIDE + 1:STRIDE]     # (N, CIN, OH, OW)
            taps.append(sub)
    # (N, CIN, KH*KW, OH, OW)
    pat = jnp.stack(taps, axis=2)
    # split channel into groups: (N, G, CIN_G, KH*KW, OH, OW)
    pat = pat.reshape(N, GROUPS, CIN_G, KH * KW, OH, OW)
    # -> (G, CIN_G, KH*KW, N, OH, OW)  : K-order = (cin_g, tap), M-order = (n, oh, ow)
    pat = jnp.transpose(pat, (1, 2, 3, 0, 4, 5))
    # -> (G*K, M) then pad rows up to KTOT_PAD
    pat = pat.reshape(GROUPS * K, M)
    return jnp.pad(pat, ((0, KTOT_PAD - KTOT), (0, 0)))


def _block_diag_weight(conv_w):
    """(COUT, CIN_G, KH, KW) -> block-diagonal (COUT, KTOT_PAD)."""
    w = conv_w.reshape(GROUPS, COUT_G, K)                      # K order = (cin_g, kh, kw)
    wbd = jnp.zeros((COUT, KTOT_PAD), jnp.float32)
    wbd = wbd.at[:COUT_G, :K].set(w[0])
    wbd = wbd.at[COUT_G:, K:2 * K].set(w[1])
    return wbd


def model_forward(x, conv_w, conv_b, bn_gamma, bn_beta):
    """x: (N, CIN, H, W) float32 -> (N, COUT, OH, OW) float32."""
    patches = _im2col_grouped_t(x)                             # (KTOT_PAD, M)
    wbd = _block_diag_weight(conv_w)                           # (COUT, KTOT_PAD)
    params = jnp.stack([conv_b, bn_gamma, bn_beta], axis=1)    # (COUT, 3)

    vmem = pl.BlockSpec(memory_space=pltpu.MemorySpace.VMEM)
    out = pl.pallas_call(
        fused_conv_bn_act_kernel,
        out_shape=jax.ShapeDtypeStruct((COUT, M), jnp.float32),
        in_specs=[vmem, vmem, vmem],
        out_specs=vmem,
    )(patches, wbd, params)

    # (COUT, M) columns ordered (n, oh, ow) -> NCHW
    return jnp.transpose(out.reshape(COUT, N, OH, OW), (1, 0, 2, 3))


# ------------------------------ reference -----------------------------------
def reference_forward(x, conv_w, conv_b, bn_gamma, bn_beta):
    v1 = lax.conv_general_dilated(
        x, conv_w,
        window_strides=(STRIDE, STRIDE),
        padding=((PAD, PAD), (PAD, PAD)),
        rhs_dilation=(DIL, DIL),
        dimension_numbers=("NCHW", "OIHW", "NCHW"),
        feature_group_count=GROUPS,
    ) + conv_b[None, :, None, None]
    v2 = jnp.maximum(v1, 0.0)
    mean = jnp.mean(v1, axis=(0, 2, 3), keepdims=True)
    var = jnp.mean((v1 - mean) ** 2, axis=(0, 2, 3), keepdims=True)
    v3 = (v1 - mean) / jnp.sqrt(var + EPS) * bn_gamma[None, :, None, None] \
        + bn_beta[None, :, None, None]
    v4 = jax.nn.sigmoid(v2 + v3)
    return v3 * v4


if __name__ == "__main__":
    key = jax.random.PRNGKey(0)
    kx, kw, kb = jax.random.split(key, 3)

    x = jax.random.normal(kx, (N, CIN, H, W), dtype=jnp.float32)
    # deterministic parameter init (synthetic; no checkpoint load)
    fan_in = CIN_G * KH * KW
    bound = 1.0 / (fan_in ** 0.5)
    conv_w = jax.random.uniform(kw, (COUT, CIN_G, KH, KW),
                                minval=-bound, maxval=bound, dtype=jnp.float32)
    conv_b = jax.random.uniform(kb, (COUT,),
                                minval=-bound, maxval=bound, dtype=jnp.float32)
    bn_gamma = jnp.ones((COUT,), jnp.float32)
    bn_beta = jnp.zeros((COUT,), jnp.float32)

    out = jax.jit(model_forward)(x, conv_w, conv_b, bn_gamma, bn_beta)
    out = jax.block_until_ready(out)

    ref = reference_forward(x, conv_w, conv_b, bn_gamma, bn_beta)
    assert out.shape == (N, COUT, OH, OW), out.shape
    assert jnp.allclose(out, ref, atol=1e-4, rtol=1e-4), \
        float(jnp.max(jnp.abs(out - ref)))

    print("KERNEL_OK")
</pallas_src>

<mosaic_0001>
module attributes {stable_mosaic.version = 11 : i64} {
  func.func @fused_conv_bn_act_kernel(%arg0: memref<40x128xf32, #tpu.memory_space<vmem>>, %arg1: memref<16x40xf32, #tpu.memory_space<vmem>>, %arg2: memref<16x3xf32, #tpu.memory_space<vmem>>, %arg3: memref<16x128xf32, #tpu.memory_space<vmem>>) attributes {dimension_semantics = [], scalar_prefetch = 0 : i64, scratch_operands = 0 : i64, tpu.core_type = #tpu.core_type<tc>} {
    %c0 = arith.constant 0 : index
    %c0_0 = arith.constant 0 : index
    %0 = vector.load %arg2[%c0, %c0_0] : memref<16x3xf32, #tpu.memory_space<vmem>>, vector<16x1xf32>
    %c0_1 = arith.constant 0 : index
    %c1 = arith.constant 1 : index
    %1 = vector.load %arg2[%c0_1, %c1] : memref<16x3xf32, #tpu.memory_space<vmem>>, vector<16x1xf32>
    %c0_2 = arith.constant 0 : index
    %c2 = arith.constant 2 : index
    %2 = vector.load %arg2[%c0_2, %c2] : memref<16x3xf32, #tpu.memory_space<vmem>>, vector<16x1xf32>
    %c0_3 = arith.constant 0 : index
    %c0_4 = arith.constant 0 : index
    %3 = vector.load %arg1[%c0_3, %c0_4] : memref<16x40xf32, #tpu.memory_space<vmem>>, vector<16x40xf32>
    %c0_5 = arith.constant 0 : index
    %c0_6 = arith.constant 0 : index
    %4 = vector.load %arg0[%c0_5, %c0_6] : memref<40x128xf32, #tpu.memory_space<vmem>>, vector<40x128xf32>
    %cst = arith.constant dense<0.000000e+00> : vector<16x128xf32>
    %5 = tpu.matmul %3, %4, %cst {dimension_numbers = #tpu.dot_dimension_numbers<[1], [0], [0], [1], [0, 0, 1, 1], [], []>} : vector<16x40xf32>, vector<40x128xf32>, vector<16x128xf32> -> vector<16x128xf32>
    %6 = vector.broadcast %0 : vector<16x1xf32> to vector<16x128xf32>
    %7 = arith.addf %5, %6 : vector<16x128xf32>
    %cst_7 = arith.constant dense<0.000000e+00> : vector<16xf32>
    %8 = vector.multi_reduction <add>, %7, %cst_7 [1] : vector<16x128xf32> to vector<16xf32>
    %9 = vector.shape_cast %8 : vector<16xf32> to vector<16x1xf32>
    %10 = arith.mulf %7, %7 : vector<16x128xf32>
    %cst_8 = arith.constant dense<0.000000e+00> : vector<16xf32>
    %11 = vector.multi_reduction <add>, %10, %cst_8 [1] : vector<16x128xf32> to vector<16xf32>
    %12 = vector.shape_cast %11 : vector<16xf32> to vector<16x1xf32>
    %cst_9 = arith.constant 7.812500e-03 : f32
    %13 = vector.broadcast %cst_9 : f32 to vector<16x1xf32>
    %14 = arith.mulf %9, %13 : vector<16x1xf32>
    %cst_10 = arith.constant 7.812500e-03 : f32
    %15 = vector.broadcast %cst_10 : f32 to vector<16x1xf32>
    %16 = arith.mulf %12, %15 : vector<16x1xf32>
    %17 = arith.mulf %14, %14 : vector<16x1xf32>
    %18 = arith.subf %16, %17 : vector<16x1xf32>
    %cst_11 = arith.constant 0.000000e+00 : f32
    %19 = vector.broadcast %cst_11 : f32 to vector<16x1xf32>
    %20 = arith.maximumf %18, %19 : vector<16x1xf32>
    %cst_12 = arith.constant 9.99999974E-6 : f32
    %21 = vector.broadcast %cst_12 : f32 to vector<16x1xf32>
    %22 = arith.addf %20, %21 : vector<16x1xf32>
    %23 = math.rsqrt %22 : vector<16x1xf32>
    %24 = arith.mulf %1, %23 : vector<16x1xf32>
    %25 = arith.mulf %14, %24 : vector<16x1xf32>
    %26 = arith.subf %2, %25 : vector<16x1xf32>
    %27 = vector.broadcast %24 : vector<16x1xf32> to vector<16x128xf32>
    %28 = arith.mulf %7, %27 : vector<16x128xf32>
    %29 = vector.broadcast %26 : vector<16x1xf32> to vector<16x128xf32>
    %30 = arith.addf %28, %29 : vector<16x128xf32>
    %cst_13 = arith.constant 0.000000e+00 : f32
    %31 = vector.broadcast %cst_13 : f32 to vector<16x128xf32>
    %32 = arith.maximumf %7, %31 : vector<16x128xf32>
    %33 = arith.addf %32, %30 : vector<16x128xf32>
    %34 = arith.negf %33 : vector<16x128xf32>
    %35 = math.exp %34 : vector<16x128xf32>
    %cst_14 = arith.constant 1.000000e+00 : f32
    %36 = vector.broadcast %cst_14 : f32 to vector<16x128xf32>
    %37 = arith.addf %36, %35 : vector<16x128xf32>
    %38 = arith.divf %36, %37 : vector<16x128xf32>
    %39 = arith.mulf %30, %38 : vector<16x128xf32>
    %c0_15 = arith.constant 0 : index
    %c0_16 = arith.constant 0 : index
    %40 = vector.load %arg3[%c0_15, %c0_16] : memref<16x128xf32, #tpu.memory_space<vmem>>, vector<16x128xf32>
    tpu.vector_store %arg3[%c0_15, %c0_16], %39 {strides = array<i32>} : memref<16x128xf32, #tpu.memory_space<vmem>>, vector<16x128xf32>,
    return
  }
}

</mosaic_0001>

<bundles_post_ra>
// kernel: model_forward.1
= control target key start
LH: loop header
LB: loop body
LE: loop exit
PB: predicated region body
PF: predicated region fallthrough
CT: control target
= control target key end

     0   :  { %v223_v2 = vmov 0   ;;  %vm33_vm0 = vcmask 326656   ;;  %v224_v18 = vmov 1   ;;  %v226_v53 = vmov 2   ;;  %s304_s0 = inlined_call_operand.vmem [shape: f32[40,128], index: 0, kind: input, shape index: {}]   ;;  %s305_s2 = inlined_call_operand.vmem [shape: f32[16,3], index: 2, kind: input, shape index: {}]   ;;  %s306_s1 = inlined_call_operand.vmem [shape: f32[16,40], index: 1, kind: input, shape index: {}]   ;;  %s307_s3 = inlined_call_operand.vmem [shape: f32[16,128], index: 3, kind: output, shape index: {}]  }
   0x1   :  { %v22_v0 = vld [vmem:[%s304_s0 + $0x20] sm:$0xff]  ;;  %v21_v1 = vld [vmem:[%s304_s0 + $0x18] sm:$0xff]  ;;  %206 = vset.pattern.permute.xlu0 %v223_v2  ;;  %v20_v3 = vld [vmem:[%s304_s0 + $0x10] sm:$0xff]  ;;  %207 = vset.pattern.permute.xlu2 %v224_v18 }
   0x2   :  { %51 = vmatpush.msra.mxu0 %v22_v0  ;;  %197 = vmatpush.msra.mxu1 %v22_v0  ;;  %v259_v4 = vld [vmem:[%s305_s2] sm:$0xff]  ;;  %v19_v5 = vld [vmem:[%s304_s0 + $0x8] sm:$0xff] }
   0x3   :  { %25 = vperm.xlu0 %206, %v259_v4   ;;  %v18_v6 = vld [vmem:[%s304_s0] sm:$0xff]  ;;  %v17_v8 = vld [vmem:[%s306_s1 + $0x8] sm:$0xff]  ;;  %s225_s0 = smov 1  }
   0x4   :  { %52 = vmatpush.msra.mxu0 %v21_v1  ;;  %198 = vmatpush.msra.mxu1 %v21_v1  ;;  %v16_v7 = vld [vmem:[%s306_s1] sm:$0xff]  ;;  %v277_v9 = vld [vmem:[%s305_s2 + $0x8] sm:$0xff] }
   0x6   :  { %53 = vmatpush.msra.mxu0 %v20_v3  ;;  %199 = vmatpush.msra.mxu1 %v20_v3 }
   0x8   :  { %54 = vmatpush.msra.mxu0 %v19_v5  ;;  %200 = vmatpush.msra.mxu1 %v19_v5 }
   0xa   :  { %55 = vmatpush.msra.mxu0 %v18_v6  ;;  %201 = vmatpush.msra.mxu1 %v18_v6 }
   0xb   :  { %193 = vmatmul.msk.f32.vlgmr.msra.gmra.mxu0 %vm33_vm0, %v16_v7  ;;  %194 = vmatmul.msk.f32.vlgmr.msra.gmra.mxu1 %vm33_vm0, %v17_v8 }
   0xc   :  { %30 = vperm.xlu0 %206, %v277_v9  }
  0x14   :  { %208 = vset.pattern.permute.xlu0 %v224_v18 }
  0x75   :  { %v26_v10 = vpop.permute.xlu0 %25 }
  0x7e   :  { %v31_v14 = vpop.permute.xlu0 %30 }
  0x88   :  { %v57_v11 = vpop.f32.mrf.mxu0  ;;  %v60_v15 = vpop.f32.mrf.mxu1 }
  0x89   :  { %v280_v12 = vadd.f32 %v57_v11, %v26_v10  ;;  %v285_v16 = vadd.f32 %v60_v15, %v31_v14 }
  0x8b   :  { %63 = vadd.xlane.f32.xlu1 %v280_v12  ;;  %v67_v13 = vmul.f32 %v280_v12, %v280_v12  ;;  %v68_v17 = vmul.f32 %v285_v16, %v285_v16  ;;  %v144_v62 = vmax.f32 %v285_v16, 0.0  ;;  %v143_v6 = vmax.f32 %v280_v12, 0.0 }
  0x8d   :  { %69 = vadd.xlane.f32.xlu2 %v67_v13 }
  0x93   :  { %65 = vadd.xlane.f32.xlu1 %v285_v16 }
  0x95   :  { %71 = vadd.xlane.f32.xlu2 %v68_v17 }
  0xfe   :  { %v64_v19 = vpop.xlane.xlu1 %63 }
  0xff   :  { %v73_v20 = vmul.f32 0.0078125, %v64_v19 }
 0x100   :  { %v70_v21 = vpop.xlane.xlu2 %69 }
 0x101   :  { %v77_v22 = vmul.f32 %v73_v20, %v73_v20  ;;  %v75_v23 = vmul.f32 0.0078125, %v70_v21 }
 0x103   :  { %v79_v24 = vsub.f32 %v75_v23, %v77_v22 }
 0x105   :  { %v81_v25 = vmax.f32 %v79_v24, 0.0 }
 0x106   :  { %v66_v26 = vpop.xlane.xlu1 %65 }
 0x107   :  { %v83_v27 = vadd.f32 1e-05, %v81_v25  ;;  %v74_v28 = vmul.f32 0.0078125, %v66_v26 }
 0x108   :  { %v72_v29 = vpop.xlane.xlu2 %71 }
 0x109   :  { %211 = vrsqrt.f32 %v83_v27  ;;  %v78_v30 = vmul.f32 %v74_v28, %v74_v28  ;;  %v76_v31 = vmul.f32 0.0078125, %v72_v29  ;;  %vm91_vm2 = vweird.f32 %v83_v27 }
 0x10b   :  { %v80_v32 = vsub.f32 %v76_v31, %v78_v30 }
 0x10d   :  { %v82_v33 = vmax.f32 %v80_v32, 0.0 }
 0x10f   :  { %v212_v34 = vpop.eup %211  ;;  %v84_v35 = vadd.f32 1e-05, %v82_v33 }
 0x110   :  { %v86_v36 = vmul.f32 %v212_v34, %v83_v27  ;;  %vm92_vm1 = vweird.f32 %v212_v34 }
 0x111   :  { %213 = vrsqrt.f32 %v84_v35  ;;  %vm93_vm3 = vmor %vm91_vm2, %vm92_vm1  ;;  %vm101_vm5 = vweird.f32 %v84_v35 }
 0x112   :  { %v87_v37 = vmul.f32 %v212_v34, %v86_v36 }
 0x114   :  { %v88_v38 = vmul.f32 0.5, %v87_v37 }
 0x116   :  { %v89_v39 = vsub.f32 1.5, %v88_v38 }
 0x117   :  { %v214_v40 = vpop.eup %213 }
 0x118   :  { %v96_v41 = vmul.f32 %v214_v40, %v84_v35  ;;  %v90_v42 = vmul.f32 %v212_v34, %v89_v39  ;;  %vm102_vm4 = vweird.f32 %v214_v40 }
 0x119   :  { %vm103_vm6 = vmor %vm101_vm5, %vm102_vm4 }
 0x11a   :  { %v97_v43 = vmul.f32 %v214_v40, %v96_v41  ;;  %v94_v44 = vsel %vm93_vm3, %v212_v34, %v90_v42 }
 0x11b   :  { %v105_v45 = vmul.f32 %v94_v44, %v259_v4 }
 0x11c   :  { %v98_v46 = vmul.f32 0.5, %v97_v43 }
 0x11d   :  { %121 = vperm.xlu2 %207, %v105_v45   ;;  %v107_v47 = vmul.f32 %v105_v45, %v73_v20 }
 0x11e   :  { %v99_v48 = vsub.f32 1.5, %v98_v46 }
 0x11f   :  { %111 = vrot.lane.b32.xlu0 %v107_v47, %s225_s0 }
 0x120   :  { %v100_v49 = vmul.f32 %v214_v40, %v99_v48 }
 0x122   :  { %v104_v50 = vsel %vm103_vm6, %v214_v40, %v100_v49 }
 0x123   :  { %v106_v51 = vmul.f32 %v104_v50, %v277_v9 }
 0x125   :  { %v108_v52 = vmul.f32 %v106_v51, %v74_v28  ;;  %210 = vset.pattern.permute.xlu2 %v226_v53 }
 0x127   :  { %126 = vperm.xlu0 %208, %v106_v51   ;;  %113 = vrot.lane.b32.xlu1 %v108_v52, %s225_s0 }
 0x12f   :  { %209 = vset.pattern.permute.xlu0 %v226_v53 }
 0x177   :  { %v122_v58 = vpop.permute.xlu2 %121 }
 0x191   :  { %v112_v54 = vpop.permute.xlu0 %111 }
 0x192   :  { %v117_v55 = vsub.f32 %v259_v4, %v112_v54  ;;  %v129_v4 = vmul.f32 %v122_v58, %v280_v12 }
 0x194   :  { %133 = vperm.xlu0 %209, %v117_v55  }
 0x199   :  { %v114_v56 = vpop.permute.xlu1 %113  ;;  %v127_v59 = vpop.permute.xlu0 %126 }
 0x19a   :  { %v118_v57 = vsub.f32 %v277_v9, %v114_v56  ;;  %v130_v60 = vmul.f32 %v127_v59, %v285_v16 }
 0x19c   :  { %138 = vperm.xlu2 %210, %v118_v57  }
 0x1f6   :  { %v139_v61 = vpop.permute.xlu2 %138 }
 0x1f7   :  { %v142_v63 = vadd.f32 %v139_v61, %v130_v60 }
 0x1f9   :  { %v146_v0 = vadd.f32 %v144_v62, %v142_v63 }
 0x1fb   :  { %v196_v1 = vmul.f32 -1.442695, %v146_v0 }
 0x1fd   :  { %215 = vpow2.f32 %v196_v1 }
 0x203   :  { %v216_v2 = vpop.eup %215 }
 0x204   :  { %v154_v3 = vadd.f32 1.0, %v216_v2 }
 0x206   :  { %217 = vrcp.f32 %v154_v3  ;;  %v134_v5 = vpop.permute.xlu0 %133  ;;  %v181_v14 = vand.u32 2147483648, %v154_v3  ;;  %v179_v16 = vand.u32 2147483647, %v154_v3  ;;  %vm175_vm8 = vweird.f32 %v154_v3 }
 0x207   :  { %v141_v7 = vadd.f32 %v134_v5, %v129_v4 }
 0x208   :  { %v182_v19 = vor.u32 1.1754944e-38, %v181_v14  ;;  %vm180_vm10 = vcmp.eq.f32.partialorder %v179_v16, 8.507059e+37 }
 0x209   :  { %v145_v8 = vadd.f32 %v143_v6, %v141_v7 }
 0x20b   :  { %v195_v9 = vmul.f32 -1.442695, %v145_v8 }
 0x20c   :  { %v218_v10 = vpop.eup %217 }
 0x20d   :  { %v171_v11 = vmul.f32 %v218_v10, %v154_v3  ;;  %219 = vpow2.f32 %v195_v9  ;;  %vm176_vm7 = vweird.f32 %v218_v10 }
 0x20e   :  { %vm177_vm9 = vmor %vm175_vm8, %vm176_vm7 }
 0x20f   :  { %v172_v13 = vsub.f32 1.0, %v171_v11 }
 0x211   :  { %v173_v15 = vmul.f32 %v218_v10, %v172_v13 }
 0x213   :  { %v220_v17 = vpop.eup %219  ;;  %v174_v18 = vadd.f32 %v218_v10, %v173_v15 }
 0x214   :  { %v153_v20 = vadd.f32 1.0, %v220_v17 }
 0x215   :  { %v178_v21 = vsel %vm177_vm9, %v218_v10, %v174_v18 }
 0x216   :  { %v183_v12 = vsel %vm180_vm10, %v182_v19, %v178_v21  ;;  %221 = vrcp.f32 %v153_v20  ;;  %v166_v26 = vand.u32 2147483648, %v153_v20  ;;  %v164_v28 = vand.u32 2147483647, %v153_v20 }
 0x217   :  { %v186_v22 = vmul.f32 %v183_v12, %v142_v63  ;;  %vm160_vm12 = vweird.f32 %v153_v20 }
 0x218   :  { %v167_v30 = vor.u32 1.1754944e-38, %v166_v26  ;;  %vm165_vm14 = vcmp.eq.f32.partialorder %v164_v28, 8.507059e+37 }
 0x219   :  { %188 = vst [vmem:[%s307_s3 + $0x8] sm:$0xff] %v186_v22 }
 0x21c   :  { %v222_v23 = vpop.eup %221 }
 0x21d   :  { %v156_v24 = vmul.f32 %v222_v23, %v153_v20  ;;  %vm161_vm11 = vweird.f32 %v222_v23 }
 0x21e   :  { %vm162_vm13 = vmor %vm160_vm12, %vm161_vm11 }
 0x21f   :  { %v157_v25 = vsub.f32 1.0, %v156_v24 }
 0x221   :  { %v158_v27 = vmul.f32 %v222_v23, %v157_v25 }
 0x223   :  { %v159_v29 = vadd.f32 %v222_v23, %v158_v27 }
 0x225   :  { %v163_v31 = vsel %vm162_vm13, %v222_v23, %v159_v29 }
 0x226   :  { %v168_v32 = vsel %vm165_vm14, %v167_v30, %v163_v31 }
 0x227   :  { %v185_v33 = vmul.f32 %v168_v32, %v141_v7 }
 0x229   :  { %187 = vst [vmem:[%s307_s3] sm:$0xff] %v185_v33 }

</bundles_post_ra>
